<compile_context>
chip_gen: v7x
topology: tpu7x:2x2x1
jax: 0.10.0
libtpu: 0.0.40
codegen_flags: <defaults>
</compile_context>

<pallas_src>
import jax
import jax.numpy as jnp
from jax import lax
from jax.experimental import pallas as pl
from jax.experimental.pallas import tpu as pltpu


def samplenet_kernel(tok_ref, e1_ref, b1_ref, w2_ref, b2_ref, out_ref):
    tb, l_pad = tok_ref.shape            # batch tile, (padded) sequence length
    v_pad = e1_ref.shape[0]              # lane-padded vocab (contraction dim)

    tok = tok_ref[...]                                           # (tb, l_pad) int32
    vocab = lax.broadcasted_iota(jnp.int32, (tb, v_pad), 1)      # (tb, v_pad)

    # Fused embedding-gather + AdaptiveAvgPool1d(1):
    #   counts[b, v] = #{ l : tok[b, l] == v }
    # Accumulated as a single 2-D (tb, v_pad) int32 slab -- no (tb, L, v_pad)
    # one-hot intermediate and no cross-sublane reduce.  The static Python
    # loop is the fully-unrolled form (constant lane offsets, avoids dynamic
    # lane-dim slicing); live state is just the accumulator.
    # TODO(synk): for large L (>= a few hundred) move L onto a grid axis or
    # use the gather path instead of per-position compares.
    counts = jnp.zeros((tb, v_pad), jnp.int32)
    for l in range(l_pad):
        counts = counts + (vocab == tok[:, l:l + 1]).astype(jnp.int32)

    # counts <= L is exactly representable in bf16 for L <= 256 (1/L is folded
    # into E1 in the wrapper, so no scaling happens here).
    counts = counts.astype(e1_ref.dtype)

    # fc1 folded with the embedding table and the pooling mean:
    #   E1 = (emb_table @ W1^T) * (1/L)    -> one (tb,V)@(V,16) MXU pass.
    h = jnp.dot(counts, e1_ref[...],
                preferred_element_type=jnp.float32) + b1_ref[...]   # (tb, H) f32
    h = jnp.maximum(h, 0.0)

    # fc2 against the lane-padded W2^T -> unmasked, lane-dense output store.
    out = jnp.dot(h, w2_ref[...],
                  preferred_element_type=jnp.float32) + b2_ref[...]  # (tb, c_pad)
    out_ref[...] = out.astype(out_ref.dtype)


def _round_up(x, m):
    return -(-x // m) * m


def prepare_samplenet_params(emb_table, w1, b1, w2, b2, seq_len,
                             *, table_dtype=jnp.bfloat16):
    """One-time weight fold + padding (hoisted out of the per-call path).

    Weights in PyTorch layout: w1 (16,16) = (out,in), w2 (2,16) = (out,in).
    The 1/seq_len of AdaptiveAvgPool1d(1) is folded into the table so the
    kernel's counts stay integer-valued.
    """
    V, D = emb_table.shape
    H, _ = w1.shape          # 16
    C, _ = w2.shape          # 2

    emb_f32 = jnp.asarray(emb_table, jnp.float32)
    w1_t = jnp.asarray(w1, jnp.float32).T                       # (D, H)
    e1 = (emb_f32 @ w1_t) * (1.0 / seq_len)                     # (V, H), 1/L folded in

    v_pad = _round_up(max(V, 128), 128)     # lane-aligned contraction dim
    c_pad = 128                             # lane-dense output slab

    e1_p = jnp.zeros((v_pad, H), table_dtype).at[:V, :].set(e1.astype(table_dtype))
    b1_p = jnp.asarray(b1, jnp.float32).reshape(1, H)
    w2_p = jnp.zeros((H, c_pad), jnp.float32).at[:, :C].set(
        jnp.asarray(w2, jnp.float32).T)
    b2_p = jnp.zeros((1, c_pad), jnp.float32).at[:, :C].set(
        jnp.asarray(b2, jnp.float32).reshape(1, C))

    return {
        "e1": e1_p, "b1": b1_p, "w2": w2_p, "b2": b2_p,
        "v_pad": v_pad, "c_pad": c_pad, "hidden": H,
        "num_classes": C, "seq_len": seq_len,
    }


def samplenet_forward(tokens, params, *, tile_b=None):
    """tokens: (B, L) int ids; params from prepare_samplenet_params."""
    B, L = tokens.shape
    if L != params["seq_len"]:
        raise ValueError("sequence length must match the prepared params "
                         "(1/L is folded into the table)")
    v_pad, c_pad = params["v_pad"], params["c_pad"]
    H, C = params["hidden"], params["num_classes"]

    # Batch tiling: large tiles fill MXU rows and amortize per-grid-step
    # overhead; keep >= 2 grid steps when the batch allows so v7x's two
    # TensorCores both get work (neutral on v5e/v6e).  Override via tile_b
    # (e.g. 256 on v6e/v7x for big batches, VMEM permitting).
    b8 = _round_up(B, 8)
    if tile_b is None:
        tile_b = b8 if b8 <= 8 else min(128, _round_up(-(-b8 // 2), 8))
    b_pad = _round_up(b8, tile_b)

    # Sequence padding: lane-dense token tile for realistic L.  The sentinel
    # id (== v_pad, out of vocab range) matches nothing, so padded positions
    # and padded batch rows contribute exactly zero counts.
    l_pad = L if L <= 128 else _round_up(L, 128)
    sentinel = v_pad
    tok_p = jnp.full((b_pad, l_pad), sentinel, jnp.int32)
    tok_p = tok_p.at[:B, :L].set(tokens.astype(jnp.int32))

    e1_p, b1_p, w2_p, b2_p = params["e1"], params["b1"], params["w2"], params["b2"]

    # Advisory cost estimate for XLA's scheduler.
    flops = 2 * b_pad * (v_pad * H + H * c_pad)
    bytes_accessed = int(tok_p.size * 4 + e1_p.size * e1_p.dtype.itemsize
                         + w2_p.size * 4 + (H + c_pad) * 4 + b_pad * c_pad * 4)

    # Per-step VMEM budget (double-buffered worst case):
    #   2*tile_b*l_pad*4 (tok) + 2*tile_b*c_pad*4 (out)
    #   + 2*(v_pad*H*itemsize + H*c_pad*4 + (H + c_pad)*4) (resident weights)
    # which is well under 32 MiB for any tile this wrapper picks; an explicit
    # limit keeps the scoped-VMEM check predictable across v5e/v6e/v7x.
    out_p = pl.pallas_call(
        samplenet_kernel,
        out_shape=jax.ShapeDtypeStruct((b_pad, c_pad), jnp.float32),
        grid=(b_pad // tile_b,),
        in_specs=[
            pl.BlockSpec((tile_b, l_pad), lambda i: (i, 0)),   # token tile (per step)
            pl.BlockSpec((v_pad, H), lambda i: (0, 0)),        # folded table E1 (resident)
            pl.BlockSpec((1, H), lambda i: (0, 0)),            # b1 (resident)
            pl.BlockSpec((H, c_pad), lambda i: (0, 0)),        # W2^T, lane-padded (resident)
            pl.BlockSpec((1, c_pad), lambda i: (0, 0)),        # b2, lane-padded (resident)
        ],
        out_specs=pl.BlockSpec((tile_b, c_pad), lambda i: (i, 0)),
        compiler_params=pltpu.CompilerParams(
            dimension_semantics=("parallel",),                 # batch tiles split across TCs
            vmem_limit_bytes=32 * 1024 * 1024,
        ),
        cost_estimate=pl.CostEstimate(
            flops=flops, transcendentals=0, bytes_accessed=bytes_accessed),
    )(tok_p, e1_p, b1_p, w2_p, b2_p)

    return out_p[:B, :C]


def samplenet_reference(tokens, emb_table, w1, b1, w2, b2):
    # Pure-JAX reference matching the PyTorch forward exactly.
    x = emb_table[tokens]                 # (B, L, 16)
    x = jnp.mean(x, axis=1)               # AdaptiveAvgPool1d(1) + squeeze -> (B, 16)
    x = x @ w1.T + b1
    x = jnp.maximum(x, 0.0)
    x = x @ w2.T + b2
    return x


if __name__ == "__main__":
    B, L, V, D, C = 2, 8, 32, 16, 2

    key = jax.random.PRNGKey(0)
    k_tok, k_emb, k_w1, k_b1, k_w2, k_b2 = jax.random.split(key, 6)

    tokens = jax.random.randint(k_tok, (B, L), 0, V, dtype=jnp.int32)
    emb_table = jax.random.normal(k_emb, (V, D), jnp.float32) * 0.1
    w1 = jax.random.normal(k_w1, (D, D), jnp.float32) * 0.1   # PyTorch (out, in)
    b1 = jax.random.normal(k_b1, (D,), jnp.float32) * 0.1
    w2 = jax.random.normal(k_w2, (C, D), jnp.float32) * 0.1   # PyTorch (out, in)
    b2 = jax.random.normal(k_b2, (C,), jnp.float32) * 0.1

    ref = samplenet_reference(tokens, emb_table, w1, b1, w2, b2)

    # f32 table: bit-for-bit comparable tolerance.
    params_f32 = prepare_samplenet_params(emb_table, w1, b1, w2, b2, L,
                                          table_dtype=jnp.float32)
    out_f32 = jax.block_until_ready(samplenet_forward(tokens, params_f32))
    assert out_f32.shape == (B, C), out_f32.shape
    assert jnp.allclose(out_f32, ref, atol=1e-5, rtol=1e-5), (out_f32, ref)

    # Default bf16 table (the fast path on v6e/v7x): bf16 rounding of E1 only.
    params_bf16 = prepare_samplenet_params(emb_table, w1, b1, w2, b2, L)
    out_bf16 = jax.block_until_ready(samplenet_forward(tokens, params_bf16))
    assert out_bf16.shape == (B, C), out_bf16.shape
    assert jnp.allclose(out_bf16, ref, atol=5e-3, rtol=5e-3), (out_bf16, ref)

    print("KERNEL_OK")
</pallas_src>

<mosaic_0001>
module attributes {stable_mosaic.version = 11 : i64} {
  func.func @samplenet_kernel(%arg0: i32, %arg1: memref<8x8xi32, #tpu.memory_space<vmem>>, %arg2: memref<128x16xf32, #tpu.memory_space<vmem>>, %arg3: memref<1x16xf32, #tpu.memory_space<vmem>>, %arg4: memref<16x128xf32, #tpu.memory_space<vmem>>, %arg5: memref<1x128xf32, #tpu.memory_space<vmem>>, %arg6: memref<8x128xf32, #tpu.memory_space<vmem>>) attributes {dimension_semantics = [#tpu.dimension_semantics<parallel>], iteration_bounds = array<i64: 1>, scalar_prefetch = 0 : i64, scratch_operands = 0 : i64, tpu.core_type = #tpu.core_type<tc>, window_params = [{transform_indices = @transform_0, window_bounds = array<i64: 8, 8>}, {pipeline_mode = #tpu.pipeline_mode<synchronous>, transform_indices = @transform_1, window_bounds = array<i64: 128, 16>}, {pipeline_mode = #tpu.pipeline_mode<synchronous>, transform_indices = @transform_2, window_bounds = array<i64: 1, 16>}, {pipeline_mode = #tpu.pipeline_mode<synchronous>, transform_indices = @transform_3, window_bounds = array<i64: 16, 128>}, {pipeline_mode = #tpu.pipeline_mode<synchronous>, transform_indices = @transform_4, window_bounds = array<i64: 1, 128>}, {transform_indices = @transform_5, window_bounds = array<i64: 8, 128>}]} {
    %c0 = arith.constant 0 : index
    %c0_0 = arith.constant 0 : index
    %0 = vector.load %arg1[%c0, %c0_0] : memref<8x8xi32, #tpu.memory_space<vmem>>, vector<8x8xi32>
    %1 = tpu.iota {dimensions = array<i32: 1>} : vector<8x128xi32>
    %c0_i32 = arith.constant 0 : i32
    %2 = vector.broadcast %c0_i32 : i32 to vector<8x128xi32>
    %3 = vector.extract_strided_slice %0 {offsets = [0, 0], sizes = [8, 1], strides = [1, 1]} : vector<8x8xi32> to vector<8x1xi32>
    %4 = vector.broadcast %3 : vector<8x1xi32> to vector<8x128xi32>
    %5 = arith.cmpi eq, %1, %4 : vector<8x128xi32>
    %6 = arith.extui %5 : vector<8x128xi1> to vector<8x128xi32>
    %7 = arith.addi %2, %6 : vector<8x128xi32>
    %8 = vector.extract_strided_slice %0 {offsets = [0, 1], sizes = [8, 1], strides = [1, 1]} : vector<8x8xi32> to vector<8x1xi32>
    %9 = vector.broadcast %8 : vector<8x1xi32> to vector<8x128xi32>
    %10 = arith.cmpi eq, %1, %9 : vector<8x128xi32>
    %11 = arith.extui %10 : vector<8x128xi1> to vector<8x128xi32>
    %12 = arith.addi %7, %11 : vector<8x128xi32>
    %13 = vector.extract_strided_slice %0 {offsets = [0, 2], sizes = [8, 1], strides = [1, 1]} : vector<8x8xi32> to vector<8x1xi32>
    %14 = vector.broadcast %13 : vector<8x1xi32> to vector<8x128xi32>
    %15 = arith.cmpi eq, %1, %14 : vector<8x128xi32>
    %16 = arith.extui %15 : vector<8x128xi1> to vector<8x128xi32>
    %17 = arith.addi %12, %16 : vector<8x128xi32>
    %18 = vector.extract_strided_slice %0 {offsets = [0, 3], sizes = [8, 1], strides = [1, 1]} : vector<8x8xi32> to vector<8x1xi32>
    %19 = vector.broadcast %18 : vector<8x1xi32> to vector<8x128xi32>
    %20 = arith.cmpi eq, %1, %19 : vector<8x128xi32>
    %21 = arith.extui %20 : vector<8x128xi1> to vector<8x128xi32>
    %22 = arith.addi %17, %21 : vector<8x128xi32>
    %23 = vector.extract_strided_slice %0 {offsets = [0, 4], sizes = [8, 1], strides = [1, 1]} : vector<8x8xi32> to vector<8x1xi32>
    %24 = vector.broadcast %23 : vector<8x1xi32> to vector<8x128xi32>
    %25 = arith.cmpi eq, %1, %24 : vector<8x128xi32>
    %26 = arith.extui %25 : vector<8x128xi1> to vector<8x128xi32>
    %27 = arith.addi %22, %26 : vector<8x128xi32>
    %28 = vector.extract_strided_slice %0 {offsets = [0, 5], sizes = [8, 1], strides = [1, 1]} : vector<8x8xi32> to vector<8x1xi32>
    %29 = vector.broadcast %28 : vector<8x1xi32> to vector<8x128xi32>
    %30 = arith.cmpi eq, %1, %29 : vector<8x128xi32>
    %31 = arith.extui %30 : vector<8x128xi1> to vector<8x128xi32>
    %32 = arith.addi %27, %31 : vector<8x128xi32>
    %33 = vector.extract_strided_slice %0 {offsets = [0, 6], sizes = [8, 1], strides = [1, 1]} : vector<8x8xi32> to vector<8x1xi32>
    %34 = vector.broadcast %33 : vector<8x1xi32> to vector<8x128xi32>
    %35 = arith.cmpi eq, %1, %34 : vector<8x128xi32>
    %36 = arith.extui %35 : vector<8x128xi1> to vector<8x128xi32>
    %37 = arith.addi %32, %36 : vector<8x128xi32>
    %38 = vector.extract_strided_slice %0 {offsets = [0, 7], sizes = [8, 1], strides = [1, 1]} : vector<8x8xi32> to vector<8x1xi32>
    %39 = vector.broadcast %38 : vector<8x1xi32> to vector<8x128xi32>
    %40 = arith.cmpi eq, %1, %39 : vector<8x128xi32>
    %41 = arith.extui %40 : vector<8x128xi1> to vector<8x128xi32>
    %42 = arith.addi %37, %41 : vector<8x128xi32>
    %43 = arith.sitofp %42 : vector<8x128xi32> to vector<8x128xf32>
    %c0_1 = arith.constant 0 : index
    %c0_2 = arith.constant 0 : index
    %44 = vector.load %arg2[%c0_1, %c0_2] : memref<128x16xf32, #tpu.memory_space<vmem>>, vector<128x16xf32>
    %cst = arith.constant dense<0.000000e+00> : vector<8x16xf32>
    %45 = tpu.matmul %43, %44, %cst {dimension_numbers = #tpu.dot_dimension_numbers<[1], [0], [0], [1], [0, 0, 1, 1], [], []>} : vector<8x128xf32>, vector<128x16xf32>, vector<8x16xf32> -> vector<8x16xf32>
    %c0_3 = arith.constant 0 : index
    %c0_4 = arith.constant 0 : index
    %46 = vector.load %arg3[%c0_3, %c0_4] : memref<1x16xf32, #tpu.memory_space<vmem>>, vector<1x16xf32>
    %47 = vector.broadcast %46 : vector<1x16xf32> to vector<8x16xf32>
    %48 = arith.addf %45, %47 : vector<8x16xf32>
    %cst_5 = arith.constant 0.000000e+00 : f32
    %49 = vector.broadcast %cst_5 : f32 to vector<8x16xf32>
    %50 = arith.maximumf %48, %49 : vector<8x16xf32>
    %c0_6 = arith.constant 0 : index
    %c0_7 = arith.constant 0 : index
    %51 = vector.load %arg4[%c0_6, %c0_7] : memref<16x128xf32, #tpu.memory_space<vmem>>, vector<16x128xf32>
    %cst_8 = arith.constant dense<0.000000e+00> : vector<8x128xf32>
    %52 = tpu.matmul %50, %51, %cst_8 {dimension_numbers = #tpu.dot_dimension_numbers<[1], [0], [0], [1], [0, 0, 1, 1], [], []>} : vector<8x16xf32>, vector<16x128xf32>, vector<8x128xf32> -> vector<8x128xf32>
    %c0_9 = arith.constant 0 : index
    %c0_10 = arith.constant 0 : index
    %53 = vector.load %arg5[%c0_9, %c0_10] : memref<1x128xf32, #tpu.memory_space<vmem>>, vector<1x128xf32>
    %54 = vector.broadcast %53 : vector<1x128xf32> to vector<8x128xf32>
    %55 = arith.addf %52, %54 : vector<8x128xf32>
    %c0_11 = arith.constant 0 : index
    %c0_12 = arith.constant 0 : index
    %56 = vector.load %arg6[%c0_11, %c0_12] : memref<8x128xf32, #tpu.memory_space<vmem>>, vector<8x128xf32>
    tpu.vector_store %arg6[%c0_11, %c0_12], %55 {strides = array<i32>} : memref<8x128xf32, #tpu.memory_space<vmem>>, vector<8x128xf32>,
    return
  }
  func.func @transform_0(%arg0: i32) -> (i32, i32) {
    %c0_i32 = arith.constant 0 : i32
    %c0_i32_0 = arith.constant 0 : i32
    return %arg0, %c0_i32 : i32, i32
  }
  func.func @transform_1(%arg0: i32) -> (i32, i32) {
    %c0_i32 = arith.constant 0 : i32
    %c0_i32_0 = arith.constant 0 : i32
    %c0_i32_1 = arith.constant 0 : i32
    return %c0_i32, %c0_i32_0 : i32, i32
  }
  func.func @transform_2(%arg0: i32) -> (i32, i32) {
    %c0_i32 = arith.constant 0 : i32
    %c0_i32_0 = arith.constant 0 : i32
    %c0_i32_1 = arith.constant 0 : i32
    return %c0_i32, %c0_i32_0 : i32, i32
  }
  func.func @transform_3(%arg0: i32) -> (i32, i32) {
    %c0_i32 = arith.constant 0 : i32
    %c0_i32_0 = arith.constant 0 : i32
    %c0_i32_1 = arith.constant 0 : i32
    return %c0_i32, %c0_i32_0 : i32, i32
  }
  func.func @transform_4(%arg0: i32) -> (i32, i32) {
    %c0_i32 = arith.constant 0 : i32
    %c0_i32_0 = arith.constant 0 : i32
    %c0_i32_1 = arith.constant 0 : i32
    return %c0_i32, %c0_i32_0 : i32, i32
  }
  func.func @transform_5(%arg0: i32) -> (i32, i32) {
    %c0_i32 = arith.constant 0 : i32
    %c0_i32_0 = arith.constant 0 : i32
    return %arg0, %c0_i32 : i32, i32
  }
}

</mosaic_0001>

<bundles_post_ra>
// kernel: tpu_custom_call.1
= control target key start
LH: loop header
LB: loop body
LE: loop exit
PB: predicated region body
PF: predicated region fallthrough
CT: control target
= control target key end

     0   :  { %v401_v2 = vmov 2   ;;  %v402_v3 = vmov 0   ;;  %v403_v8 = vmov 0.0|0.0   ;;  %s527_s0 = inlined_call_operand.vmem [shape: s32[8,8], index: 0, kind: input, shape index: {}]   ;;  %s528_s1 = inlined_call_operand.vmem [shape: f32[128,16], index: 1, kind: input, shape index: {}]   ;;  %s529_s2 = inlined_call_operand.vmem [shape: f32[1,16], index: 2, kind: input, shape index: {}]   ;;  %s530_s3 = inlined_call_operand.vmem [shape: f32[16,128], index: 3, kind: input, shape index: {}]   ;;  %s531_s4 = inlined_call_operand.vmem [shape: f32[1,128], index: 4, kind: input, shape index: {}]   ;;  %s532_s5 = inlined_call_operand.hbm [shape: f32[8,128], index: 5, kind: output, shape index: {}]  }
   0x1   :  { %v21_v0 = vld [vmem:[%s527_s0] sm:$0xff]  ;;  %370 = vset.pattern.permute.xlu1 %v401_v2  ;;  %368 = vset.pattern.permute.xlu0 %v402_v3  ;;  %v73_v4 = vld [vmem:[%s528_s1 + $0x8] sm:$0xff]  ;;  %v74_v5 = vld [vmem:[%s528_s1 + $0x10] sm:$0xff] }
   0x2   :  { %v72_v1 = vld [vmem:[%s528_s1] sm:$0xff]  ;;  %36 = vperm.xlu1 %370, %v21_v0   ;;  %25 = vperm.xlu0 %368, %v21_v0   ;;  %v75_v7 = vld [vmem:[%s528_s1 + $0x18] sm:$0xff] }
   0x3   :  { %v330_v6 = vpack.c.bf16 %v73_v4, %v72_v1  ;;  %329 = vmatprep.subr.bf16.mxu0 %v403_v8  ;;  %353 = vmatprep.subr.bf16.mxu1 %v403_v8 }
   0x4   :  { %10 = vsyncpa [#allocation3], 0  ;;  %v333_v9 = vpack.c.bf16 %v75_v7, %v74_v5  ;;  %v404_v10 = vmov 3   ;;  %v405_v11 = vmov 1   ;;  %v76_v12 = vld [vmem:[%s528_s1 + $0x20] sm:$0xff]  ;;  %v77_v13 = vld [vmem:[%s528_s1 + $0x28] sm:$0xff]  ;;  %v22_v35 = vlaneseq }
   0x5   :  { %331 = vmatpush3.bf16.msra.mxu0 %v330_v6  ;;  %v336_v14 = vpack.c.bf16 %v77_v13, %v76_v12  ;;  %v78_v15 = vld [vmem:[%s528_s1 + $0x30] sm:$0xff]  ;;  %v79_v16 = vld [vmem:[%s528_s1 + $0x38] sm:$0xff]  ;;  %v406_v17 = vmov 4   ;;  %v407_v18 = vmov 5   ;;  %v80_v20 = vld [vmem:[%s528_s1 + $0x40] sm:$0xff]  ;;  %v408_v22 = vmov 6  }
   0x6   :  { %332 = vmatprep.subr.bf16.mxu0 %v403_v8  ;;  %371 = vset.pattern.permute.xlu1 %v404_v10  ;;  %v339_v19 = vpack.c.bf16 %v79_v16, %v78_v15  ;;  %v81_v21 = vld [vmem:[%s528_s1 + $0x48] sm:$0xff]  ;;  %v409_v23 = vmov 7   ;;  %v82_v25 = vld [vmem:[%s528_s1 + $0x50] sm:$0xff]  ;;  %v83_v26 = vld [vmem:[%s528_s1 + $0x58] sm:$0xff]  ;;  %vm410_vm0 = vmmov 0   ;;  %v411_v33 = vmov 0.0  }
   0x7   :  { %369 = vset.pattern.permute.xlu0 %v405_v11  ;;  %42 = vperm.xlu1 %371, %v21_v0   ;;  %v342_v24 = vpack.c.bf16 %v81_v21, %v80_v20  ;;  %v345_v27 = vpack.c.bf16 %v83_v26, %v82_v25  ;;  %v84_v28 = vld [vmem:[%s528_s1 + $0x60] sm:$0xff]  ;;  %v85_v29 = vld [vmem:[%s528_s1 + $0x68] sm:$0xff]  ;;  %v86_v31 = vld [vmem:[%s528_s1 + $0x70] sm:$0xff]  ;;  %v23_v38 = vand.u32 127, %v22_v35  ;;  %vm175_vm9 = vcmask 130048   ;;  %s412_s7 = smov [#allocation2]  }
   0x8   :  { %30 = vperm.xlu0 %369, %v21_v0   ;;  %v348_v30 = vpack.c.bf16 %v85_v29, %v84_v28  ;;  %v87_v32 = vld [vmem:[%s528_s1 + $0x78] sm:$0xff]  ;;  %319 = vmatprep.mubr.msk.f32.mxu0 %vm410_vm0, %v411_v33  ;;  %v166_v61 = vld [vmem:[%s530_s3] sm:$0xff]  ;;  %v167_v62 = vld [vmem:[%s530_s3 + $0x8] sm:$0xff]  ;;  %s256_s8 = sshll.u32 %s412_s7, 4  ;;  %s257_s8 = int_to_ptr.vmem [resolvable:$true] %s256_s8 }
   0x9   :  { %334 = vmatpush3.bf16.msra.mxu0 %v333_v9  ;;  %326 = vmatprep.mubr.msk.f32.mxu1 %vm410_vm0, %v411_v33  ;;  %v351_v34 = vpack.c.bf16 %v87_v32, %v86_v31  ;;  %v354_v63 = vpack.c.bf16 %v167_v62, %v166_v61  ;;  %v265_v5 = vld [vmem:[%s531_s4] ss:$0 sm:$0xff]  ;;  %s377_s3 = scalar_lea.vmem %s257_s8, 128  ;;  %p382_p1 = scmp.lt.s32.totalorder %s257_s8, %s257_s8 }
   0xa   :  { %335 = vmatprep.subr.bf16.mxu0 %v403_v8  ;;  %p378_p0 = scmp.ne.s32.totalorder %s257_s8, %s377_s3  ;;  %p383_p2 = scmp.lt.s32.totalorder %s377_s3, %s377_s3 }
   0xb   :  { %372 = vset.pattern.permute.xlu1 %v406_v17  ;;  %355 = vmatpush3.bf16.msra.mxu1 %v354_v63 }
   0xc   :  { %373 = vset.pattern.permute.xlu0 %v407_v18  ;;  %48 = vperm.xlu1 %372, %v21_v0   ;;  %p384_p3 = por %p383_p2, %p382_p1 }
   0xd   :  { %54 = vperm.xlu0 %373, %v21_v0   ;;  %337 = vmatpush3.bf16.msra.mxu0 %v336_v14 }
   0xe   :  { %338 = vmatprep.subr.bf16.mxu0 %v403_v8  ;;  %p385_p4 = pnand %p384_p3, %p378_p0 }
  0x10   :  { %374 = vset.pattern.permute.xlu1 %v408_v22 }
  0x11   :  { %376 = vset.pattern.permute.xlu0 %v409_v23  ;;  %60 = vperm.xlu1 %374, %v21_v0  }
  0x12   :  { %340 = vmatpush3.bf16.msra.mxu0 %v339_v19 }
  0x13   :  { %341 = vmatprep.subr.bf16.mxu0 %v403_v8 }
  0x15   :  { %375 = vset.pattern.permute.xlu1 %v409_v23 }
  0x16   :  { %343 = vmatpush3.bf16.msra.mxu0 %v342_v24  ;;  %66 = vperm.xlu1 %375, %v21_v0   ;;  %v264_v0 = vld [vmem:[%s529_s2] ss:$0 sm:$0xff] }
  0x17   :  { %344 = vmatprep.subr.bf16.mxu0 %v403_v8 }
  0x1a   :  { %346 = vmatpush3.bf16.msra.mxu0 %v345_v27 }
  0x1b   :  { %347 = vmatprep.subr.bf16.mxu0 %v403_v8 }
  0x1e   :  { %349 = vmatpush3.bf16.msra.mxu0 %v348_v30 }
  0x1f   :  { %350 = vmatprep.subr.bf16.mxu0 %v403_v8 }
  0x22   :  { %352 = vmatpush3.bf16.msra.mxu0 %v351_v34 }
  0x81   :  { %v37_v36 = vpop.permute.xlu1 %36  ;;  %v26_v37 = vpop.permute.xlu0 %25 }
  0x82   :  { %vm27_vm1 = vcmp.eq.s32.totalorder %v23_v38, %v26_v37  ;;  %vm38_vm2 = vcmp.eq.s32.totalorder %v23_v38, %v37_v36 }
  0x83   :  { %v28_v41 = vsel %vm27_vm1, 1, %v402_v3  ;;  %v39_v44 = vsel %vm38_vm2, 1, %v402_v3 }
  0x86   :  { %v43_v39 = vpop.permute.xlu1 %42 }
  0x87   :  { %v31_v40 = vpop.permute.xlu0 %30  ;;  %vm44_vm4 = vcmp.eq.s32.totalorder %v23_v38, %v43_v39 }
  0x88   :  { %vm32_vm3 = vcmp.eq.s32.totalorder %v23_v38, %v31_v40  ;;  %v45_v48 = vsel %vm44_vm4, 1, %v402_v3 }
  0x89   :  { %v33_v42 = vsel %vm32_vm3, 1, %v402_v3 }
  0x8a   :  { %v34_v43 = vadd.s32 %v33_v42, %v28_v41 }
  0x8b   :  { %v49_v46 = vpop.permute.xlu1 %48 }
  0x8c   :  { %v40_v45 = vadd.s32 %v39_v44, %v34_v43  ;;  %v55_v47 = vpop.permute.xlu0 %54  ;;  %vm50_vm5 = vcmp.eq.s32.totalorder %v23_v38, %v49_v46 }
  0x8d   :  { %vm56_vm6 = vcmp.eq.s32.totalorder %v23_v38, %v55_v47  ;;  %v51_v50 = vsel %vm50_vm5, 1, %v402_v3 }
  0x8e   :  { %v46_v49 = vadd.s32 %v45_v48, %v40_v45  ;;  %v57_v52 = vsel %vm56_vm6, 1, %v402_v3 }
  0x90   :  { %v52_v51 = vadd.s32 %v51_v50, %v46_v49  ;;  %v61_v53 = vpop.permute.xlu1 %60 }
  0x91   :  { %vm62_vm7 = vcmp.eq.s32.totalorder %v23_v38, %v61_v53 }
  0x92   :  { %v58_v54 = vadd.s32 %v57_v52, %v52_v51  ;;  %v63_v55 = vsel %vm62_vm7, 1, %v402_v3 }
  0x94   :  { %v64_v57 = vadd.s32 %v63_v55, %v58_v54 }
  0x95   :  { %v67_v56 = vpop.permute.xlu1 %66 }
  0x96   :  { %vm68_vm8 = vcmp.eq.s32.totalorder %v23_v38, %v67_v56 }
  0x97   :  { %v69_v58 = vsel %vm68_vm8, 1, %v402_v3 }
  0x98   :  { %v70_v59 = vadd.s32 %v69_v58, %v64_v57 }
  0x9a   :  { %v71_v60 = vcvt.s32.f32 %v70_v59 }
  0x9c   :  { %320 = vmatmul.mubr.f32.vlgmr.msra.gmra.mrb[0].mxu0 %v71_v60 }
 0x16f   :  { %v161_v1 = vpop.f32.mrb[0].mxu0 }
 0x170   :  { %v162_v2 = vadd.f32 %v264_v0, %v161_v1  ;;  %v321_v3 = vpop.f32.mrb[1].mxu0 }
 0x172   :  { %v165_v4 = vmax.f32 %v162_v2, 0.0 }
 0x174   :  { %327 = vmatmul.mubr.msk.f32.vlgmr.msra.gmra.mrb[0].mxu1 %vm175_vm9, %v165_v4 }
 0x247   :  { %v245_v6 = vpop.f32.mrb[0].mxu1 }
 0x248   :  { %v246_v7 = vadd.f32 %v265_v5, %v245_v6  ;;  %v328_v8 = vpop.f32.mrb[1].mxu1 }
 0x24a   :  { %249 = vst [vmem:[#allocation2] sm:$0xff] %v246_v7 }
 0x24b   :  { %388 = shalt.err (!%p385_p4)
}
 0x24c   :  { %s389_s10 = scalar_lea.hbm %s532_s5, 128 }
 0x24d   :  { %p390_p5 = scmp.ne.s32.totalorder %s532_s5, %s389_s10  ;;  %p393_p6 = scmp.lt.u32.totalorder %s389_s10, %s532_s5 }
 0x24f   :  { %p395_p7 = pnand %p393_p6, %p390_p5 }
 0x251   :  { %398 = shalt.err (!%p395_p7)
}
 0x252   :  { %259 = dma.vmem_to_hbm [thread:$0]  %s257_s8, 128, %s532_s5, [#allocation3]  }
 0x253   :  { %399 = dma.done.wait [#allocation3], 128  }
 0x254   :  { %400 = vsyncadd [#allocation3], 4294967168 }
 0x255   :  { %263 = vsyncpa [#allocation3], 1 }

</bundles_post_ra>
